<compile_context>
chip_gen: v5e
topology: v5e:2x2
jax: 0.10.0
libtpu: 0.0.40
codegen_flags: <defaults>
</compile_context>

<pallas_src>
import math
import jax
import jax.numpy as jnp
from jax.experimental import pallas as pl
from jax.experimental.pallas import tpu as pltpu


def gate_conc_kernel(x_ref, h_ref, w1t_ref, w2t_ref, b_ref, o_ref):
    # x_ref, h_ref: (tm, H); w1t_ref, w2t_ref: (H, H) in compute dtype (bf16);
    # b_ref: (1, H) f32; o_ref: (tm, 2H)
    x = x_ref[...]
    h = h_ref[...]

    # bf16 matmuls on the MXU, f32 accumulation; bias folded into the same
    # f32 accumulator before the sigmoid.
    gated = (
        jnp.dot(x.astype(w1t_ref.dtype), w1t_ref[...],
                preferred_element_type=jnp.float32)
        + jnp.dot(h.astype(w2t_ref.dtype), w2t_ref[...],
                  preferred_element_type=jnp.float32)
        + b_ref[...]
    )
    gate = jax.nn.sigmoid(gated)  # f32 elementwise (exp on the EUP slot)

    xf = x.astype(jnp.float32)
    hf = h.astype(jnp.float32)
    # One lane-dense, full-width store instead of two half-width column stores.
    out = jnp.concatenate([xf * gate, hf * (1.0 - gate)], axis=-1)
    o_ref[...] = out.astype(o_ref.dtype)


def gate_conc_mechanism(x, hidden, w1, w2, bias, *, tm=256,
                        compute_dtype=jnp.bfloat16):
    """x, hidden: (B, S, H). w1, w2: (H, H). bias: (H,). Returns (B, S, 2H)."""
    B, S, H = x.shape
    M = B * S

    # Clamp the row tile for small problems; pad rows to a multiple of tm.
    tm = int(min(tm, M))
    grid_m = pl.cdiv(M, tm)
    Mpad = grid_m * tm

    x2 = x.reshape(M, H)
    h2 = hidden.reshape(M, H)
    if Mpad != M:
        pad = ((0, Mpad - M), (0, 0))
        x2 = jnp.pad(x2, pad)
        h2 = jnp.pad(h2, pad)

    # NOTE: if the weights are reused across many calls, hoist these two lines
    # (transpose + bf16 cast) out of the per-call path.
    w1t = w1.T.astype(compute_dtype)
    w2t = w2.T.astype(compute_dtype)
    b2 = bias.reshape(1, H).astype(jnp.float32)

    # VMEM budget: resident weights (x2 to cover pipelining slack) +
    # double-buffered x/h/out tiles + headroom; capped at 64 MiB (v7x per-TC).
    itm = jnp.dtype(x.dtype).itemsize
    w_bytes = 2 * H * H * jnp.dtype(compute_dtype).itemsize
    io_bytes = 2 * (2 * tm * H * itm + tm * 2 * H * itm)
    vmem_limit = int(min(64 * 1024 * 1024,
                         2 * w_bytes + io_bytes + (4 << 20)))

    out = pl.pallas_call(
        gate_conc_kernel,
        out_shape=jax.ShapeDtypeStruct((Mpad, 2 * H), x.dtype),
        grid_spec=pltpu.PrefetchScalarGridSpec(
            num_scalar_prefetch=0,
            grid=(grid_m,),
            in_specs=[
                pl.BlockSpec((tm, H), lambda i: (i, 0)),   # x rows
                pl.BlockSpec((tm, H), lambda i: (i, 0)),   # hidden rows
                pl.BlockSpec((H, H), lambda i: (0, 0)),    # w1.T (resident bf16)
                pl.BlockSpec((H, H), lambda i: (0, 0)),    # w2.T (resident bf16)
                pl.BlockSpec((1, H), lambda i: (0, 0)),    # bias (f32)
            ],
            out_specs=pl.BlockSpec((tm, 2 * H), lambda i: (i, 0)),
        ),
        compiler_params=pltpu.CompilerParams(
            dimension_semantics=("parallel",),
            vmem_limit_bytes=vmem_limit,
        ),
    )(x2, h2, w1t, w2t, b2)

    # TODO(synk): for very large H (>= ~4K) on v7x the two resident (H, H)
    # weights no longer fit VMEM; add an N-tiling grid axis over the hidden
    # dim instead of keeping them fully resident.

    if Mpad != M:
        out = out[:M]
    return out.reshape(B, S, 2 * H)


def init_params(key, hidden_size, dtype=jnp.float32):
    """Mirror of GateConcMechanism.reset_parameters (uniform inits)."""
    k1, k2, k3 = jax.random.split(key, 3)
    stdv1 = 1.0 / math.sqrt(hidden_size)
    stdv2 = 1.0 / math.sqrt(hidden_size)
    stdv = (stdv1 + stdv2) / 2.0
    w1 = jax.random.uniform(k1, (hidden_size, hidden_size), dtype, -stdv1, stdv1)
    w2 = jax.random.uniform(k2, (hidden_size, hidden_size), dtype, -stdv2, stdv2)
    bias = jax.random.uniform(k3, (hidden_size,), dtype, -stdv, stdv)
    return w1, w2, bias


if __name__ == "__main__":
    B, S, H = 2, 8, 32
    key = jax.random.PRNGKey(0)
    kx, kh, kp = jax.random.split(key, 3)

    x = jax.random.normal(kx, (B, S, H), jnp.float32)
    hidden = jax.random.normal(kh, (B, S, H), jnp.float32)
    w1, w2, bias = init_params(kp, H)

    fn = jax.jit(gate_conc_mechanism)
    out = fn(x, hidden, w1, w2, bias)
    out = jax.block_until_ready(out)

    # Reference in plain JAX (f32); kernel matmuls run in bf16, so use a
    # correspondingly loose tolerance.
    gated = x @ w1.T + hidden @ w2.T + bias
    gate = jax.nn.sigmoid(gated)
    ref = jnp.concatenate([x * gate, hidden * (1.0 - gate)], axis=2)
    assert out.shape == (B, S, 2 * H)
    assert jnp.allclose(out, ref, atol=2e-2, rtol=2e-2)

    print("KERNEL_OK")
</pallas_src>

<mosaic_0001>
module attributes {stable_mosaic.version = 11 : i64} {
  func.func @gate_conc_kernel(%arg0: i32, %arg1: memref<16x32xf32, #tpu.memory_space<vmem>>, %arg2: memref<16x32xf32, #tpu.memory_space<vmem>>, %arg3: memref<32x32xbf16, #tpu.memory_space<vmem>>, %arg4: memref<32x32xbf16, #tpu.memory_space<vmem>>, %arg5: memref<1x32xf32, #tpu.memory_space<vmem>>, %arg6: memref<16x64xf32, #tpu.memory_space<vmem>>) attributes {dimension_semantics = [#tpu.dimension_semantics<parallel>], iteration_bounds = array<i64: 1>, scalar_prefetch = 0 : i64, scratch_operands = 0 : i64, tpu.core_type = #tpu.core_type<tc>, window_params = [{transform_indices = @transform_0, window_bounds = array<i64: 16, 32>}, {transform_indices = @transform_1, window_bounds = array<i64: 16, 32>}, {pipeline_mode = #tpu.pipeline_mode<synchronous>, transform_indices = @transform_2, window_bounds = array<i64: 32, 32>}, {pipeline_mode = #tpu.pipeline_mode<synchronous>, transform_indices = @transform_3, window_bounds = array<i64: 32, 32>}, {pipeline_mode = #tpu.pipeline_mode<synchronous>, transform_indices = @transform_4, window_bounds = array<i64: 1, 32>}, {transform_indices = @transform_5, window_bounds = array<i64: 16, 64>}]} {
    %c0 = arith.constant 0 : index
    %c0_0 = arith.constant 0 : index
    %0 = vector.load %arg1[%c0, %c0_0] : memref<16x32xf32, #tpu.memory_space<vmem>>, vector<16x32xf32>
    %c0_1 = arith.constant 0 : index
    %c0_2 = arith.constant 0 : index
    %1 = vector.load %arg2[%c0_1, %c0_2] : memref<16x32xf32, #tpu.memory_space<vmem>>, vector<16x32xf32>
    %2 = arith.truncf %0 : vector<16x32xf32> to vector<16x32xbf16>
    %c0_3 = arith.constant 0 : index
    %c0_4 = arith.constant 0 : index
    %3 = vector.load %arg3[%c0_3, %c0_4] : memref<32x32xbf16, #tpu.memory_space<vmem>>, vector<32x32xbf16>
    %cst = arith.constant dense<0.000000e+00> : vector<16x32xf32>
    %4 = tpu.matmul %2, %3, %cst {dimension_numbers = #tpu.dot_dimension_numbers<[1], [0], [0], [1], [0, 0, 1, 1], [], []>} : vector<16x32xbf16>, vector<32x32xbf16>, vector<16x32xf32> -> vector<16x32xf32>
    %5 = arith.truncf %1 : vector<16x32xf32> to vector<16x32xbf16>
    %c0_5 = arith.constant 0 : index
    %c0_6 = arith.constant 0 : index
    %6 = vector.load %arg4[%c0_5, %c0_6] : memref<32x32xbf16, #tpu.memory_space<vmem>>, vector<32x32xbf16>
    %cst_7 = arith.constant dense<0.000000e+00> : vector<16x32xf32>
    %7 = tpu.matmul %5, %6, %cst_7 {dimension_numbers = #tpu.dot_dimension_numbers<[1], [0], [0], [1], [0, 0, 1, 1], [], []>} : vector<16x32xbf16>, vector<32x32xbf16>, vector<16x32xf32> -> vector<16x32xf32>
    %8 = arith.addf %4, %7 : vector<16x32xf32>
    %c0_8 = arith.constant 0 : index
    %c0_9 = arith.constant 0 : index
    %9 = vector.load %arg5[%c0_8, %c0_9] : memref<1x32xf32, #tpu.memory_space<vmem>>, vector<1x32xf32>
    %10 = vector.broadcast %9 : vector<1x32xf32> to vector<16x32xf32>
    %11 = arith.addf %8, %10 : vector<16x32xf32>
    %12 = arith.negf %11 : vector<16x32xf32>
    %13 = math.exp %12 : vector<16x32xf32>
    %cst_10 = arith.constant 1.000000e+00 : f32
    %14 = vector.broadcast %cst_10 : f32 to vector<16x32xf32>
    %15 = arith.addf %14, %13 : vector<16x32xf32>
    %16 = arith.divf %14, %15 : vector<16x32xf32>
    %17 = arith.mulf %0, %16 : vector<16x32xf32>
    %cst_11 = arith.constant 1.000000e+00 : f32
    %18 = vector.broadcast %cst_11 : f32 to vector<16x32xf32>
    %19 = arith.subf %18, %16 : vector<16x32xf32>
    %20 = arith.mulf %1, %19 : vector<16x32xf32>
    %21 = tpu.concatenate %17, %20 in 1 : vector<16x32xf32>, vector<16x32xf32> -> vector<16x64xf32>
    %c0_12 = arith.constant 0 : index
    %c0_13 = arith.constant 0 : index
    %22 = vector.load %arg6[%c0_12, %c0_13] : memref<16x64xf32, #tpu.memory_space<vmem>>, vector<16x64xf32>
    tpu.vector_store %arg6[%c0_12, %c0_13], %21 {strides = array<i32>} : memref<16x64xf32, #tpu.memory_space<vmem>>, vector<16x64xf32>,
    return
  }
  func.func @transform_0(%arg0: i32) -> (i32, i32) {
    %c0_i32 = arith.constant 0 : i32
    %c0_i32_0 = arith.constant 0 : i32
    return %arg0, %c0_i32 : i32, i32
  }
  func.func @transform_1(%arg0: i32) -> (i32, i32) {
    %c0_i32 = arith.constant 0 : i32
    %c0_i32_0 = arith.constant 0 : i32
    return %arg0, %c0_i32 : i32, i32
  }
  func.func @transform_2(%arg0: i32) -> (i32, i32) {
    %c0_i32 = arith.constant 0 : i32
    %c0_i32_0 = arith.constant 0 : i32
    %c0_i32_1 = arith.constant 0 : i32
    return %c0_i32, %c0_i32_0 : i32, i32
  }
  func.func @transform_3(%arg0: i32) -> (i32, i32) {
    %c0_i32 = arith.constant 0 : i32
    %c0_i32_0 = arith.constant 0 : i32
    %c0_i32_1 = arith.constant 0 : i32
    return %c0_i32, %c0_i32_0 : i32, i32
  }
  func.func @transform_4(%arg0: i32) -> (i32, i32) {
    %c0_i32 = arith.constant 0 : i32
    %c0_i32_0 = arith.constant 0 : i32
    %c0_i32_1 = arith.constant 0 : i32
    return %c0_i32, %c0_i32_0 : i32, i32
  }
  func.func @transform_5(%arg0: i32) -> (i32, i32) {
    %c0_i32 = arith.constant 0 : i32
    %c0_i32_0 = arith.constant 0 : i32
    return %arg0, %c0_i32 : i32, i32
  }
}

</mosaic_0001>

<bundles_post_ra>
// kernel: gate_conc_mechanism.1
= control target key start
LH: loop header
LB: loop body
LE: loop exit
PB: predicated region body
PF: predicated region fallthrough
CT: control target
= control target key end

     0   :  { %s319_s0 = inlined_call_operand.vmem [shape: f32[16,32], index: 0, kind: input, shape index: {}]   ;;  %s320_s1 = inlined_call_operand.vmem [shape: f32[16,32], index: 1, kind: input, shape index: {}]   ;;  %s321_s2 = inlined_call_operand.vmem [shape: bf16[32,32], index: 2, kind: input, shape index: {}]   ;;  %s322_s3 = inlined_call_operand.vmem [shape: bf16[32,32], index: 3, kind: input, shape index: {}]   ;;  %s323_s4 = inlined_call_operand.vmem [shape: f32[1,32], index: 4, kind: input, shape index: {}]   ;;  %s324_s5 = inlined_call_operand.hbm [shape: f32[16,64], index: 5, kind: output, shape index: {}]  }
   0x1   :  { %v199_v0 = vld [vmem:[%s322_s3 + $0x8] sm:$0xff]  ;;  %v198_v2 = vld [vmem:[%s322_s3] sm:$0xff] }
   0x2   :  { %v197_v1 = vld [vmem:[%s321_s2 + $0x8] sm:$0xff]  ;;  %v196_v3 = vld [vmem:[%s321_s2] sm:$0xff]  ;;  %58 = vmatpush.bf16.msra.mxu0 %v199_v0 }
   0x3   :  { %v24_v4 = vld [vmem:[%s320_s1] sm:$0xff]  ;;  %v291_v5 = vld [vmem:[%s320_s1 + $0x8] sm:$0xff]  ;;  %87 = vmatpush.bf16.msra.mxu1 %v197_v1 }
   0x4   :  { %v296_v6 = vld [vmem:[%s319_s0] sm:$0xff]  ;;  %v301_v7 = vld [vmem:[%s319_s0 + $0x8] sm:$0xff] }
   0x5   :  { %10 = vsyncpa [#allocation3], 0  ;;  %v31_v8 = vpack.c.bf16 %v291_v5, %v24_v4  ;;  %v26_v9 = vpack.c.bf16 %v301_v7, %v296_v6  ;;  %vm48_vm0 = vcmask 261120   ;;  %v204_v10 = vld [vmem:[%s323_s4] ss:$0 sm:$0xff]  ;;  %s239_s0 = smov 32  }
   0x6   :  { %59 = vmatpush.bf16.msra.mxu0 %v198_v2  ;;  %vm155_vm9 = vcmask 523264   ;;  %s240_s4 = smov [#allocation2]   ;;  %s164_s11 = sshll.u32 %s324_s5, 4  ;;  %s165_s11 = int_to_ptr.hbm [resolvable:$true] %s164_s11 }
   0x7   :  { %88 = vmatpush.bf16.msra.mxu1 %v196_v3  ;;  %s162_s8 = sshll.u32 %s240_s4, 4  ;;  %s241_s12 = smov 128   ;;  %s163_s8 = int_to_ptr.vmem [resolvable:$true] %s162_s8 }
   0x8   :  { %s242_s13 = smov 8  }
   0x9   :  { %184 = vmatmul.msk.bf16.vlgmr.msra.gmra.mxu0 %vm48_vm0, %v31_v8 }
   0xa   :  { %193 = vmatmul.msk.bf16.vlgmr.msra.gmra.mxu1 %vm48_vm0, %v26_v9 }
  0x86   :  { %v61_v11 = vpop.f32.mrf.mxu0 }
  0x87   :  { %v90_v12 = vpop.f32.mrf.mxu1 }
  0x88   :  { %v91_v13 = vadd.f32 %v90_v12, %v61_v11 }
  0x8a   :  { %v99_v14 = vadd.f32 %v204_v10, %v91_v13 }
  0x8c   :  { %v194_v15 = vmul.f32 -1.442695, %v99_v14 }
  0x8e   :  { %205 = vpow2.f32 %v194_v15  ;;  %v63_v16 = vpop.f32.mrf.mxu0 }
  0x8f   :  { %v92_v17 = vpop.f32.mrf.mxu1 }
  0x90   :  { %v93_v18 = vadd.f32 %v92_v17, %v63_v16 }
  0x92   :  { %v100_v19 = vadd.f32 %v204_v10, %v93_v18 }
  0x94   :  { %v206_v20 = vpop.eup %205  ;;  %v195_v21 = vmul.f32 -1.442695, %v100_v19 }
  0x95   :  { %v107_v22 = vadd.f32 1.0, %v206_v20 }
  0x96   :  { %207 = vpow2.f32 %v195_v21 }
  0x97   :  { %209 = vrcp.f32 %v107_v22  ;;  %v120_v28 = vand.u32 2147483648, %v107_v22  ;;  %v118_v30 = vand.u32 2147483647, %v107_v22  ;;  %vm114_vm2 = vweird.f32 %v107_v22 }
  0x99   :  { %v121_v33 = vor.u32 1.1754944e-38, %v120_v28  ;;  %vm119_vm4 = vcmp.eq.f32.partialorder %v118_v30, 8.507059e+37 }
  0x9c   :  { %v208_v23 = vpop.eup %207 }
  0x9d   :  { %v210_v24 = vpop.eup %209  ;;  %v108_v25 = vadd.f32 1.0, %v208_v23 }
  0x9e   :  { %v110_v26 = vmul.f32 %v210_v24, %v107_v22  ;;  %vm115_vm1 = vweird.f32 %v210_v24 }
  0x9f   :  { %211 = vrcp.f32 %v108_v25  ;;  %vm116_vm3 = vmor %vm114_vm2, %vm115_vm1  ;;  %v135_v39 = vand.u32 2147483648, %v108_v25  ;;  %v133_v42 = vand.u32 2147483647, %v108_v25  ;;  %vm129_vm6 = vweird.f32 %v108_v25 }
  0xa0   :  { %v111_v27 = vsub.f32 1.0, %v110_v26 }
  0xa1   :  { %v136_v44 = vor.u32 1.1754944e-38, %v135_v39  ;;  %vm134_vm8 = vcmp.eq.f32.partialorder %v133_v42, 8.507059e+37 }
  0xa2   :  { %v112_v29 = vmul.f32 %v210_v24, %v111_v27 }
  0xa4   :  { %v113_v31 = vadd.f32 %v210_v24, %v112_v29 }
  0xa5   :  { %v212_v32 = vpop.eup %211 }
  0xa6   :  { %v125_v34 = vmul.f32 %v212_v32, %v108_v25  ;;  %v117_v35 = vsel %vm116_vm3, %v210_v24, %v113_v31  ;;  %vm130_vm5 = vweird.f32 %v212_v32 }
  0xa7   :  { %v122_v36 = vsel %vm119_vm4, %v121_v33, %v117_v35  ;;  %vm131_vm7 = vmor %vm129_vm6, %vm130_vm5 }
  0xa8   :  { %v141_v37 = vsub.f32 1.0, %v122_v36  ;;  %v126_v38 = vsub.f32 1.0, %v125_v34  ;;  %v139_v49 = vmul.f32 %v122_v36, %v296_v6 }
  0xaa   :  { %v143_v40 = vmul.f32 %v141_v37, %v24_v4  ;;  %v127_v41 = vmul.f32 %v212_v32, %v126_v38 }
  0xac   :  { %147 = vrot.lane.b32.xlu0 %v143_v40, %s239_s0  ;;  %v128_v43 = vadd.f32 %v212_v32, %v127_v41 }
  0xae   :  { %v132_v45 = vsel %vm131_vm7, %v212_v32, %v128_v43 }
  0xaf   :  { %v137_v46 = vsel %vm134_vm8, %v136_v44, %v132_v45 }
  0xb0   :  { %v142_v47 = vsub.f32 1.0, %v137_v46  ;;  %v140_v52 = vmul.f32 %v137_v46, %v301_v7 }
  0xb2   :  { %v144_v48 = vmul.f32 %v142_v47, %v291_v5 }
  0xb4   :  { %149 = vrot.lane.b32.xlu0 %v144_v48, %s239_s0 }
 0x11e   :  { %v148_v50 = vpop.permute.xlu0 %147 }
 0x11f   :  { %v153_v51 = vsel %vm48_vm0, %v139_v49, %v148_v50 }
 0x120   :  { %156 = vst.msk [vmem:[#allocation2] sm:$0xff] %vm155_vm9, %v153_v51 }
 0x126   :  { %v150_v53 = vpop.permute.xlu0 %149 }
 0x127   :  { %v154_v54 = vsel %vm48_vm0, %v140_v52, %v150_v53 }
 0x128   :  { %157 = vst.msk [vmem:[#allocation2 + $0x8] sm:$0xff] %vm155_vm9, %v154_v54 }
 0x129   :  { %170 = dma.vmem_to_hbm [thread:$0]  %s163_s8, 256, %s165_s11, [#allocation3], %s241_s12, %s241_s12, %s242_s13  }
 0x12a   :  { %237 = dma.done.wait [#allocation3], 256  }
 0x12b   :  { %238 = vsyncadd [#allocation3], 4294967040 }
 0x12c   :  { %175 = vsyncpa [#allocation3], 1 }

</bundles_post_ra>
